<compile_context>
chip_gen: v7x
topology: tpu7x:2x2x1
jax: 0.10.0
libtpu: 0.0.40
codegen_flags: <defaults>
</compile_context>

<pallas_src>
import math

import jax
import jax.numpy as jnp
from jax.experimental import pallas as pl
from jax.experimental.pallas import tpu as pltpu


def _psn_kernel(w_ref, b_ref, x_ref, o_ref):
    # w_ref: (T, T), b_ref: (T, 1), x_ref: (T, tile_m), o_ref: (T, tile_m)
    h = jnp.dot(w_ref[...], x_ref[...], preferred_element_type=jnp.float32)
    h = h + b_ref[...]                       # broadcast (T,1) over lanes
    # ATan surrogate forward == Heaviside: spike = (h >= 0)
    o_ref[...] = (h >= 0.0).astype(o_ref.dtype)


def _choose_tile_m(M: int, T: int, in_itemsize: int, out_itemsize: int,
                   vmem_budget_bytes: int = 16 * 1024 * 1024,
                   max_tile: int = 32768) -> int:
    """Largest lane-aligned tile fitting the VMEM budget while keeping >= 2 grid steps."""
    LANE = 128
    if M <= LANE:
        return M  # single full-extent block (block dim == full array dim is legal)
    # Double-buffered input block + double-buffered output block, per column.
    per_col_bytes = 2 * T * (in_itemsize + out_itemsize)
    cap = (vmem_budget_bytes // max(per_col_bytes, 1)) // LANE * LANE
    cap = max(LANE, min(cap, max_tile))
    # Keep at least 2 grid steps (v7x megacore) when M allows it.
    half = -(-M // 2)                 # ceil(M / 2)
    half = -(-half // LANE) * LANE    # round up to a multiple of 128 lanes
    return min(cap, half)


def psn_forward(weight: jax.Array, bias: jax.Array, x_seq: jax.Array,
                tile_m: int | None = None,
                out_dtype=None) -> jax.Array:
    """weight: [T, T], bias: [T, 1], x_seq: [T, ...] -> spike_seq with x_seq's shape.

    out_dtype defaults to x_seq.dtype (matches PyTorch). Spikes are exactly 0/1, so a
    narrower dtype (bf16/int8) is lossless and halves store traffic if downstream allows.
    """
    T = x_seq.shape[0]
    x_flat = x_seq.reshape(T, -1)            # [T, M]
    M = x_flat.shape[1]
    out_dtype = x_flat.dtype if out_dtype is None else out_dtype

    if tile_m is None:
        tile_m = _choose_tile_m(M, T, x_flat.dtype.itemsize,
                                jnp.dtype(out_dtype).itemsize)

    grid = (pl.cdiv(M, tile_m),)

    cost = pl.CostEstimate(
        flops=2 * T * T * M,
        transcendentals=0,
        bytes_accessed=(T * M * x_flat.dtype.itemsize            # read x
                        + T * M * jnp.dtype(out_dtype).itemsize  # write spikes
                        + T * T * weight.dtype.itemsize          # weight
                        + T * bias.dtype.itemsize),              # bias
    )

    out = pl.pallas_call(
        _psn_kernel,
        out_shape=jax.ShapeDtypeStruct((T, M), out_dtype),
        grid_spec=pltpu.PrefetchScalarGridSpec(
            num_scalar_prefetch=0,
            grid=grid,
            in_specs=[
                pl.BlockSpec((T, T), lambda j: (0, 0)),        # weight, resident
                pl.BlockSpec((T, 1), lambda j: (0, 0)),        # bias, resident
                pl.BlockSpec((T, tile_m), lambda j: (0, j)),   # x tile
            ],
            out_specs=pl.BlockSpec((T, tile_m), lambda j: (0, j)),
        ),
        compiler_params=pltpu.CompilerParams(
            dimension_semantics=("parallel",),
        ),
        cost_estimate=cost,
    )(weight, bias, x_flat)

    return out.reshape(x_seq.shape)


def init_psn_params(key: jax.Array, T: int):
    """Deterministic re-implementation of the PyTorch init.

    nn.init.kaiming_uniform_(weight, a=sqrt(5)) on a [T, T] matrix:
      fan_in = T, gain = sqrt(2 / (1 + 5)), bound = gain * sqrt(3 / fan_in) = 1/sqrt(T)
    bias = -1.0
    """
    bound = 1.0 / math.sqrt(T)
    weight = jax.random.uniform(key, (T, T), dtype=jnp.float32,
                                minval=-bound, maxval=bound)
    bias = jnp.full((T, 1), -1.0, dtype=jnp.float32)
    return weight, bias


def _reference_h(weight, bias, x_seq):
    T = x_seq.shape[0]
    h = jnp.dot(weight, x_seq.reshape(T, -1),
                precision=jax.lax.Precision.HIGHEST) + bias
    return h


def _check(weight, bias, x_seq, spike_seq, tag):
    """Robust check: kernel may disagree with the reference only where |h| is at the
    thresholding boundary (matmul precision/rounding differences)."""
    h_ref = _reference_h(weight, bias, x_seq)
    ref = (h_ref >= 0.0).astype(x_seq.dtype).reshape(x_seq.shape)
    mism = spike_seq != ref
    if bool(jnp.any(mism)):
        near_zero = jnp.abs(h_ref.reshape(x_seq.shape)) < 1e-4
        assert bool(jnp.all(jnp.logical_or(~mism, near_zero))), \
            f"mismatch vs reference away from decision boundary ({tag})"
    assert spike_seq.shape == x_seq.shape, f"shape mismatch ({tag})"
    # Output must be exactly 0/1.
    assert bool(jnp.all(jnp.logical_or(spike_seq == 0, spike_seq == 1))), \
        f"non-binary spikes ({tag})"


if __name__ == "__main__":
    key = jax.random.PRNGKey(0)
    k_w, k_x, k_x2 = jax.random.split(key, 3)

    T, N, C, H, W = 8, 2, 4, 16, 16          # M = N*C*H*W = 2048
    weight, bias = init_psn_params(k_w, T)
    x_seq = jax.random.normal(k_x, (T, N, C, H, W), dtype=jnp.float32)

    spike_seq = jax.block_until_ready(psn_forward(weight, bias, x_seq))
    _check(weight, bias, x_seq, spike_seq, "divisible M")

    # Exercise the non-divisible / masked-last-tile path (M = 3*5*7*3 = 315).
    x_seq2 = jax.random.normal(k_x2, (T, 3, 5, 7, 3), dtype=jnp.float32)
    spike_seq2 = jax.block_until_ready(psn_forward(weight, bias, x_seq2))
    _check(weight, bias, x_seq2, spike_seq2, "non-divisible M")

    print("KERNEL_OK")
</pallas_src>

<mosaic_0001>
module attributes {stable_mosaic.version = 11 : i64} {
  func.func @_psn_kernel(%arg0: i32, %arg1: memref<8x8xf32, #tpu.memory_space<vmem>>, %arg2: memref<8x1xf32, #tpu.memory_space<vmem>>, %arg3: memref<8x1024xf32, #tpu.memory_space<vmem>>, %arg4: memref<8x1024xf32, #tpu.memory_space<vmem>>) attributes {dimension_semantics = [#tpu.dimension_semantics<parallel>], iteration_bounds = array<i64: 2>, scalar_prefetch = 0 : i64, scratch_operands = 0 : i64, tpu.core_type = #tpu.core_type<tc>, window_params = [{pipeline_mode = #tpu.pipeline_mode<synchronous>, transform_indices = @transform_0, window_bounds = array<i64: 8, 8>}, {pipeline_mode = #tpu.pipeline_mode<synchronous>, transform_indices = @transform_1, window_bounds = array<i64: 8, 1>}, {transform_indices = @transform_2, window_bounds = array<i64: 8, 1024>}, {transform_indices = @transform_3, window_bounds = array<i64: 8, 1024>}]} {
    %c0 = arith.constant 0 : index
    %c0_0 = arith.constant 0 : index
    %0 = vector.load %arg1[%c0, %c0_0] : memref<8x8xf32, #tpu.memory_space<vmem>>, vector<8x8xf32>
    %c0_1 = arith.constant 0 : index
    %c0_2 = arith.constant 0 : index
    %1 = vector.load %arg3[%c0_1, %c0_2] : memref<8x1024xf32, #tpu.memory_space<vmem>>, vector<8x1024xf32>
    %cst = arith.constant dense<0.000000e+00> : vector<8x1024xf32>
    %2 = tpu.matmul %0, %1, %cst {dimension_numbers = #tpu.dot_dimension_numbers<[1], [0], [0], [1], [0, 0, 1, 1], [], []>} : vector<8x8xf32>, vector<8x1024xf32>, vector<8x1024xf32> -> vector<8x1024xf32>
    %c0_3 = arith.constant 0 : index
    %c0_4 = arith.constant 0 : index
    %3 = vector.load %arg2[%c0_3, %c0_4] : memref<8x1xf32, #tpu.memory_space<vmem>>, vector<8x1xf32>
    %4 = vector.broadcast %3 : vector<8x1xf32> to vector<8x1024xf32>
    %5 = arith.addf %2, %4 : vector<8x1024xf32>
    %cst_5 = arith.constant 0.000000e+00 : f32
    %6 = vector.broadcast %cst_5 : f32 to vector<8x1024xf32>
    %7 = arith.cmpf oge, %5, %6 : vector<8x1024xf32>
    %8 = arith.extui %7 : vector<8x1024xi1> to vector<8x1024xi32>
    %9 = arith.sitofp %8 : vector<8x1024xi32> to vector<8x1024xf32>
    %c0_6 = arith.constant 0 : index
    %c0_7 = arith.constant 0 : index
    %10 = vector.load %arg4[%c0_6, %c0_7] : memref<8x1024xf32, #tpu.memory_space<vmem>>, vector<8x1024xf32>
    tpu.vector_store %arg4[%c0_6, %c0_7], %9 {strides = array<i32>} : memref<8x1024xf32, #tpu.memory_space<vmem>>, vector<8x1024xf32>,
    return
  }
  func.func @transform_0(%arg0: i32) -> (i32, i32) {
    %c0_i32 = arith.constant 0 : i32
    %c0_i32_0 = arith.constant 0 : i32
    %c0_i32_1 = arith.constant 0 : i32
    return %c0_i32, %c0_i32_0 : i32, i32
  }
  func.func @transform_1(%arg0: i32) -> (i32, i32) {
    %c0_i32 = arith.constant 0 : i32
    %c0_i32_0 = arith.constant 0 : i32
    %c0_i32_1 = arith.constant 0 : i32
    return %c0_i32, %c0_i32_0 : i32, i32
  }
  func.func @transform_2(%arg0: i32) -> (i32, i32) {
    %c0_i32 = arith.constant 0 : i32
    %c0_i32_0 = arith.constant 0 : i32
    return %c0_i32, %arg0 : i32, i32
  }
  func.func @transform_3(%arg0: i32) -> (i32, i32) {
    %c0_i32 = arith.constant 0 : i32
    %c0_i32_0 = arith.constant 0 : i32
    return %c0_i32, %arg0 : i32, i32
  }
}

</mosaic_0001>

<bundles_post_ra>
// kernel: tpu_custom_call.1
= control target key start
LH: loop header
LB: loop body
LE: loop exit
PB: predicated region body
PF: predicated region fallthrough
CT: control target
= control target key end

     0   :  { %8 = vsyncpa [#allocation3], 0  ;;  %s995_s0 = inlined_call_operand.vmem [shape: f32[8,8], index: 0, kind: input, shape index: {}]   ;;  %s996_s1 = inlined_call_operand.vmem [shape: f32[8,1], index: 1, kind: input, shape index: {}]   ;;  %s997_s2 = inlined_call_operand.hbm [shape: f32[8,2048], index: 2, kind: input, shape index: {}]   ;;  %s998_s3 = inlined_call_operand.hbm [shape: f32[8,2048], index: 3, kind: output, shape index: {}]  }
   0x1   :  { %10 = vsyncpa [#allocation3 + $0x1], 0 }
   0x2   :  { %11 = vsyncpa [#allocation4], 0 }
   0x3   :  { %13 = vsyncpa [#allocation4 + $0x1], 0  ;;  %s808_s12 = smov 0   ;;  %s810_s13 = smov 0  }
   0x4   :  { %s812_s14 = smov 0   ;;  %s814_s15 = smov 0  }
   0x5 LB: > { %s829_s16 = sadd.s32 4294967295, %s782_s15   ;;  %s609_s17 = sadd.s32 4294967294, %s782_s15   ;;  %s782_s15 = sphi %s814_s15, %s1013_s15   ;;  %s778_s14 = sphi %s812_s14, %s1012_s14   ;;  %s774_s13 = sphi %s810_s13, %s1011_s13   ;;  %s770_s12 = sphi %s808_s12, %s1010_s12  }
   0x6   : > { %s833_s18 = sadd.s32 1, %s782_s15   ;;  %s68_s19 = sadd.s32 1, %s778_s14 }
   0x7   : > { %s65_s20 = ssub.s32 %s782_s15, %s833_s18  ;;  %p75_p0 = scmp.ne.s32.totalorder %s778_s14, %s774_s13 }
   0x8   : > { %p66_p1 = scmp.eq.s32.totalorder %s65_s20, 0  ;;  %p76_p2 = scmp.eq.s32.totalorder %s782_s15, 0 }
   0x9   : > { %p81_p3 = scmp.ne.s32.totalorder %s774_s13, %s770_s12  ;;  %p82_p4 = scmp.eq.s32.totalorder %s829_s16, 0 }
   0xa   : > { %s845_s21 = scalar_select %p66_p1, %s778_s14, %s68_s19  }
   0xb   : > { %p847_p5 = por %p76_p2, %p75_p0  ;;  %p851_p6 = por %p82_p4, %p81_p3 }
   0xc   : > { %p105_p7 = scmp.eq.s32.totalorder %s829_s16, 1  ;;  %p111_p8 = scmp.eq.s32.totalorder %s609_s17, 1 }
   0xd   : > { %p649_p10 = scmp.lt.s32.totalorder %s782_s15, 2  ;;  %s137_s26 = sand.u32 1, %s778_s14  }
   0xe   : > { %p858_p11 = por %p105_p7, %p75_p0  ;;  %p862_p12 = por %p111_p8, %p81_p3 }
   0xf   : > { %s635_s27 = sshll.u32 %s782_s15, 10  ;;  %s612_s28 = sshll.u32 %s137_s26, 6 }
  0x10   : > { %s1002_s24 = scalar_select %p858_p11, 1, 0 }
  0x11   : > { %s1003_s25 = scalar_select %p862_p12, 1, 0 }
  0x12   : > { %s871_s4 = scalar_lea.hbm %s997_s2, %s635_s27  ;;  %s141_s5 = scalar_lea.vmem [#allocation2], %s612_s28 }
  0x13   : > { %s149_s6 = sshll.u32 %s141_s5, 4  ;;  %p875_p13 = pnand %p649_p10, %p847_p5  ;;  %s879_s6 = int_to_ptr.vmem [resolvable:$true] %s149_s6 }
  0x14   : > { %s138_s8 = scalar_lea.sflag [#allocation3], %s137_s26  ;;  %s686_s9 = scalar_lea.hbm %s871_s4, 1024 }
  0x15   : > { %p687_p2 = scmp.ne.s32.totalorder %s871_s4, %s686_s9  ;;  %p688_p3 = pneg %p875_p13 }
  0x16   : > { %s691_s17 = scalar_lea.hbm %s997_s2, 2048  ;;  %p692_p5 = scmp.lt.u32.totalorder %s871_s4, %s997_s2 }
  0x17   : > { %p689_p4 = pnand %p688_p3, %p687_p2  ;;  %p693_p8 = scmp.lt.u32.totalorder %s691_s17, %s686_s9 }
  0x18   : > { %p695_p9 = scmp.lt.u32.totalorder %s686_s9, %s871_s4 }
  0x19   : > { %p690_p7 = pneg %p689_p4  ;;  %p694_p10 = por %p693_p8, %p692_p5 }
  0x1b   : > { %p696_p0 = por %p695_p9, %p694_p10 }
  0x1d   : > { %p697_p1 = pnand %p696_p0, %p690_p7 }
  0x1f   : > { %700 = shalt.err (!%p697_p1)
}
  0x20   : > { %s701_s22 = scalar_lea.vmem %s879_s6, 1024  ;;  %s784_s26 = smov [#allocation2]  }
  0x21   : > { %p702_p2 = scmp.ne.s32.totalorder %s879_s6, %s701_s22  ;;  %s706_s27 = sshll.u32 %s784_s26, 4  ;;  %s707_s27 = int_to_ptr.vmem [resolvable:$false] %s706_s27 }
  0x22   : > { %s708_s28 = scalar_lea.vmem %s707_s27, 2048  ;;  %p709_p11 = scmp.lt.s32.totalorder %s879_s6, %s707_s27 }
  0x23   : > { %p704_p4 = pnand %p702_p2, %p688_p3  ;;  %p710_p5 = scmp.lt.s32.totalorder %s708_s28, %s701_s22 }
  0x25   : > { %p705_p12 = pneg %p704_p4  ;;  %p711_p8 = por %p710_p5, %p709_p11 }
  0x27   : > { %p712_p9 = pnand %p711_p8, %p705_p12 }
  0x29   : > { %715 = shalt.err (!%p712_p9)
}
  0x2a   : > { %644 = dma.hbm_to_vmem [thread:$0]  (!%p875_p13), %s871_s4, 1024, %s879_s6, %s138_s8  }
  0x2b   : > { %p1005_p0 = scmp.lt.s32.totalorder %s782_s15, 3  ;;  %p1006_p1 = scmp.ge.s32.totalorder %s782_s15, 1 }
  0x2d   : > { %p155_p3 = pnand %p1006_p1, %p1005_p0 }
  0x2e   : > { %s913_s29 = sand.u32 (!%p155_p3), 1, %s774_s13  }
  0x2f   : > { %158 = sbr.rel (%p155_p3) target bundleno = 295 (0x127), region = 32  ;;  %s616_s30 = sshll.u32 (!%p155_p3), %s913_s29, 6 }
  0x30   : > { %s161_s5 = scalar_lea.sflag (!%p155_p3), [#allocation3], %s913_s29  ;;  %s164_s7 = scalar_lea.vmem (!%p155_p3), [#allocation2], %s616_s30 }
  0x36   : > { %761 = dma.done.wait (%p851_p6), %s161_s5, 1024  }
  0x37   : > { %763 = vsyncadd (%p851_p6), %s161_s5, 4294966272  ;;  %v785_v0 = vmov 0.0   ;;  %v786_v1 = vmov 0   ;;  %v191_v2 = vld [vmem:[%s164_s7 + $0x8] sm:$0xff]  ;;  %v193_v3 = vld [vmem:[%s164_s7 + $0x18] sm:$0xff]  ;;  %vm204_vm0 = vcmask 64512  }
  0x38   : > { %272 = vmatprep.mubr.f32.mxu0 %v785_v0  ;;  %343 = vmatprep.mubr.f32.mxu1 %v785_v0  ;;  %v190_v4 = vld [vmem:[%s164_s7] sm:$0xff]  ;;  %v192_v5 = vld [vmem:[%s164_s7 + $0x10] sm:$0xff]  ;;  %v195_v7 = vld [vmem:[%s164_s7 + $0x28] sm:$0xff]  ;;  %s186_s9 = scalar_lea.vmem [#allocation5], %s616_s30  ;;  %s636_s10 = sshll.u32 %s829_s16, 10 }
  0x39   : > { %685 = vset.pattern.permute.xlu0 %v786_v1  ;;  %208 = vmatprep.subr.mxu0 %v191_v2  ;;  %v189_v6 = vld [vmem:[%s995_s0] sm:$0xff]  ;;  %v197_v8 = vld [vmem:[%s164_s7 + $0x38] sm:$0xff]  ;;  %v196_v10 = vld [vmem:[%s164_s7 + $0x30] sm:$0xff]  ;;  %s539_s11 = sshll.u32 %s186_s9, 4  ;;  %s949_s20 = scalar_lea.hbm %s998_s3, %s636_s10  ;;  %s951_s11 = int_to_ptr.vmem [resolvable:$true] %s539_s11 }
  0x3a   : > { %279 = vmatprep.subr.mxu1 %v193_v3  ;;  %209 = vmatpush1.msra.mxu0 %v190_v4  ;;  %v194_v9 = vld [vmem:[%s164_s7 + $0x20] sm:$0xff]  ;;  %s525_s16 = scalar_lea.sflag [#allocation4], %s913_s29  ;;  %s716_s22 = scalar_lea.vmem %s951_s11, 1024 }
  0x3b   : > { %280 = vmatpush1.msra.mxu1 %v192_v5  ;;  %618 = vmatmul.mubr.msk.f32.vlgmr.msra.gmra.mrb[0].mxu0 %vm204_vm0, %v189_v6  ;;  %v198_v11 = vld [vmem:[%s996_s1] sm:$0xff]  ;;  %p717_p6 = scmp.ne.s32.totalorder %s951_s11, %s716_s22  ;;  %p1007_p11 = scmp.ne.s32.totalorder %s1002_s24, 0 }
  0x3c   : > { %619 = vmatmul.mubr.msk.f32.vlgmr.msra.gmra.mrb[0].mxu1 %vm204_vm0, %v189_v6  ;;  %350 = vmatprep.subr.mxu0 %v195_v7  ;;  %s787_s26 = smov [#allocation5]  }
  0x3d   : > { %421 = vmatprep.subr.mxu1 %v197_v8  ;;  %351 = vmatpush1.msra.mxu0 %v194_v9  ;;  %p718_p12 = pnand %p717_p6, %p1007_p11  ;;  %s720_s27 = sshll.u32 %s787_s26, 4  ;;  %s721_s27 = int_to_ptr.vmem [resolvable:$false] %s720_s27 }
  0x3e   : > { %422 = vmatpush1.msra.mxu1 %v196_v10  ;;  %414 = vmatprep.mubr.f32.mxu0 %v785_v0  ;;  %s722_s28 = scalar_lea.vmem %s721_s27, 2048  ;;  %p723_p7 = scmp.lt.s32.totalorder %s951_s11, %s721_s27 }
  0x3f   : > { %485 = vmatprep.mubr.f32.mxu1 %v785_v0  ;;  %620 = vmatmul.mubr.msk.f32.vlgmr.msra.gmra.mrb[2].mxu0 %vm204_vm0, %v189_v6  ;;  %p719_p13 = pneg %p718_p12  ;;  %p724_p10 = scmp.lt.s32.totalorder %s722_s28, %s716_s22 }
  0x40   : > { %621 = vmatmul.mubr.msk.f32.vlgmr.msra.gmra.mrb[2].mxu1 %vm204_vm0, %v189_v6  ;;  %201 = vperm.xlu0 %685, %v198_v11  }
  0x41   : > { %p725_p2 = por %p724_p10, %p723_p7 }
  0x43   : > { %p726_p4 = pnand %p725_p2, %p719_p13 }
  0xbf   : > { %v202_v12 = vpop.permute.xlu0 %201 }
 0x10e   : > { %v274_v13 = vpop.f32.mrb[0].mxu0 }
 0x10f   : > { %v345_v14 = vpop.f32.mrb[0].mxu1  ;;  %v275_v15 = vadd.f32 %v274_v13, %v202_v12  ;;  %v276_v17 = vpop.f32.mrb[1].mxu0 }
 0x110   : > { %v346_v16 = vadd.f32 %v345_v14, %v202_v12  ;;  %v347_v18 = vpop.f32.mrb[1].mxu1  ;;  %v277_v19 = vadd.f32 %v276_v17, %v202_v12 }
 0x111   : > { %v348_v20 = vadd.f32 %v347_v18, %v202_v12  ;;  %vm492_vm1 = vcmp.ge.f32.partialorder %v275_v15, 0.0 }
 0x112   : > { %vm494_vm2 = vcmp.ge.f32.partialorder %v346_v16, 0.0  ;;  %v622_v21 = vsel %vm492_vm1, 1.0, %v785_v0  ;;  %vm493_vm3 = vcmp.ge.f32.partialorder %v277_v19, 0.0  ;;  %v416_v23 = vpop.f32.mrb[2].mxu0 }
 0x113   : > { %v624_v22 = vsel %vm494_vm2, 1.0, %v785_v0  ;;  %vm495_vm4 = vcmp.ge.f32.partialorder %v348_v20, 0.0  ;;  %v487_v24 = vpop.f32.mrb[2].mxu1  ;;  %516 = vst [vmem:[%s186_s9] sm:$0xff] %v622_v21  ;;  %v623_v25 = vsel %vm493_vm3, 1.0, %v785_v0  ;;  %v417_v27 = vadd.f32 %v416_v23, %v202_v12  ;;  %v418_v29 = vpop.f32.mrb[3].mxu0 }
 0x114   : > { %518 = vst [vmem:[%s186_s9 + $0x10] sm:$0xff] %v624_v22  ;;  %v625_v26 = vsel %vm495_vm4, 1.0, %v785_v0  ;;  %v488_v28 = vadd.f32 %v487_v24, %v202_v12  ;;  %v489_v30 = vpop.f32.mrb[3].mxu1  ;;  %517 = vst [vmem:[%s186_s9 + $0x8] sm:$0xff] %v623_v25  ;;  %v419_v31 = vadd.f32 %v418_v29, %v202_v12 }
 0x115   : > { %519 = vst [vmem:[%s186_s9 + $0x18] sm:$0xff] %v625_v26  ;;  %v490_v32 = vadd.f32 %v489_v30, %v202_v12  ;;  %vm496_vm5 = vcmp.ge.f32.partialorder %v417_v27, 0.0 }
 0x116   : > { %vm498_vm6 = vcmp.ge.f32.partialorder %v488_v28, 0.0  ;;  %v626_v33 = vsel %vm496_vm5, 1.0, %v785_v0  ;;  %vm497_vm7 = vcmp.ge.f32.partialorder %v419_v31, 0.0 }
 0x117   : > { %v628_v34 = vsel %vm498_vm6, 1.0, %v785_v0  ;;  %vm499_vm8 = vcmp.ge.f32.partialorder %v490_v32, 0.0  ;;  %520 = vst [vmem:[%s186_s9 + $0x20] sm:$0xff] %v626_v33  ;;  %v627_v35 = vsel %vm497_vm7, 1.0, %v785_v0 }
 0x118   : > { %522 = vst [vmem:[%s186_s9 + $0x30] sm:$0xff] %v628_v34  ;;  %v629_v36 = vsel %vm499_vm8, 1.0, %v785_v0  ;;  %521 = vst [vmem:[%s186_s9 + $0x28] sm:$0xff] %v627_v35 }
 0x119   : > { %523 = vst [vmem:[%s186_s9 + $0x38] sm:$0xff] %v629_v36 }
 0x11a   : > { %729 = shalt.err (!%p726_p4)
}
 0x11b   : > { %s730_s29 = scalar_lea.hbm %s949_s20, 1024  ;;  %s734_s7 = scalar_lea.hbm %s998_s3, 2048 }
 0x11c   : > { %p731_p5 = scmp.ne.s32.totalorder %s949_s20, %s730_s29  ;;  %p735_p0 = scmp.lt.u32.totalorder %s949_s20, %s998_s3 }
 0x11d   : > { %p736_p1 = scmp.lt.u32.totalorder %s734_s7, %s730_s29  ;;  %p738_p6 = scmp.lt.u32.totalorder %s730_s29, %s949_s20 }
 0x11e   : > { %p732_p8 = pnand %p731_p5, %p1007_p11 }
 0x11f   : > { %p737_p3 = por %p736_p1, %p735_p0 }
 0x120   : > { %p733_p9 = pneg %p732_p8 }
 0x121   : > { %p739_p12 = por %p738_p6, %p737_p3 }
 0x123   : > { %p740_p13 = pnand %p739_p12, %p733_p9 }
 0x125   : > { %743 = shalt.err (!%p740_p13)
}
 0x126   : > { %639 = dma.vmem_to_hbm [thread:$0]  (%p1007_p11), %s951_s11, 1024, %s949_s20, %s525_s16  }
 0x127 PF: > { %s551_s23 = sand.u32 1, %s770_s12   ;;  %p1008_p7 = scmp.ne.s32.totalorder %s1003_s25, 0 }
 0x128   : > { %p1009_p10 = scmp.ge.s32.totalorder %s782_s15, 2  ;;  %s552_s8 = scalar_lea.sflag [#allocation4], %s551_s23 }
 0x12a   : > { %p646_p2 = pnand %p1009_p10, %p1008_p7 }
 0x12c   : > { %765 = dma.done.wait (!%p646_p2), %s552_s8, 1024  }
 0x12d   : > { %767 = vsyncadd (!%p646_p2), %s552_s8, 4294966272  ;;  %p16_p4 = scmp.ge.s32.totalorder %s833_s18, 4   ;;  %s1010_s12 = smov %s774_s13 }
 0x12e   : > { %s1011_s13 = smov %s778_s14  ;;  %s1012_s14 = smov %s845_s21 }
 0x12f   : > { %s1013_s15 = smov %s833_s18  ;;  %18 = sbr.rel (!%p16_p4) target bundleno = 5 (0x5), region = 77 }
 0x136   :  { %557 = vsyncpa [#allocation3], 1 }
 0x137   :  { %559 = vsyncpa [#allocation3 + $0x1], 1 }
 0x138   :  { %560 = vsyncpa [#allocation4], 1 }
 0x139   :  { %562 = vsyncpa [#allocation4 + $0x1], 1 }

</bundles_post_ra>
